<compile_context>
chip_gen: v5e
topology: v5e:2x2
jax: 0.10.0
libtpu: 0.0.40
codegen_flags: <defaults>
</compile_context>

<pallas_src>
import math

import jax
import jax.numpy as jnp
from jax.experimental import pallas as pl
from jax.experimental.pallas import tpu as pltpu


def _prob_attention_kernel(state_ref, ctx_ref, wqr_ref, wbd_ref, segr_ref,
                           gsum_ref, expand_ref, collapse_ref, wfcr_ref,
                           groupt_ref, out_ref):
    """One batch tile; all intermediates are lane-dense (TB, N*H) 2-D slabs."""
    f32 = jnp.float32
    NH = wqr_ref.shape[1]                       # n_nodes * hidden_dim

    state = state_ref[...]                      # (TB, D)       bf16
    ctx = ctx_ref[...]                          # (TB, N*D)     bf16

    # ---- projections: bf16 operands, f32 accumulation on the MXU -----------
    # q_rep[b, n*H + d] = Q[b, d]   (query replicated per node via tiled weight)
    q_rep = jnp.dot(state, wqr_ref[...], preferred_element_type=f32)       # (TB, NH)
    # proj = [K_mha | V_mha | K_prob] node-major, via the block-diagonal weight.
    proj = jnp.dot(ctx, wbd_ref[...], preferred_element_type=f32)          # (TB, 3NH)
    km = proj[:, :NH]
    vm = proj[:, NH:2 * NH]
    kp = proj[:, 2 * NH:]

    # ---- per-head logits, node-major lanes u[:, n*n_heads + h] (MXU reduce) -
    u = jnp.dot(q_rep * km, segr_ref[...], preferred_element_type=f32)     # (TB, N*nh)

    # ---- softmax over nodes for every head (f32) ----------------------------
    # Subtracting the per-row max (instead of the per-head max) leaves the
    # softmax mathematically unchanged and avoids a lane<->sublane relayout;
    # the per-head denominator is an MXU group-sum (gsum replicates each
    # head's sum onto all of that head's lanes).
    m = jnp.max(u, axis=-1, keepdims=True)
    e = jnp.exp(u - m)
    den = jnp.dot(e, gsum_ref[...], preferred_element_type=f32)
    s = e * pl.reciprocal(den, approx=False)

    # ---- expand head scores over their H lanes, weight V, reduce over nodes -
    s_full = jnp.dot(s, expand_ref[...], preferred_element_type=f32)       # (TB, NH)
    out_mha = jnp.dot(s_full * vm, collapse_ref[...],
                      preferred_element_type=f32)                          # (TB, H)

    # ---- MHA fc projection, already replicated per node (wfc tiled on host) -
    ofc_rep = jnp.dot(out_mha, wfcr_ref[...], preferred_element_type=f32)  # (TB, NH)

    # ---- ProbAttention scoring: tanh( norm * <fc_out, K_prob[n]> ) ----------
    # The node-sum matrix is contracted against the *lane* axis of both
    # operands (A @ B^T pattern), so the result comes out already transposed
    # as (N, TB) -> lane-dense, unmasked stores.
    compT = jax.lax.dot_general(
        groupt_ref[...], ofc_rep * kp,
        dimension_numbers=(((1,), (1,)), ((), ())),
        preferred_element_type=f32)                                        # (N, TB)
    out_ref[...] = jnp.tanh(compT).astype(out_ref.dtype)


def _round_up(x, m):
    return ((x + m - 1) // m) * m


def _vmem_capacity_bytes():
    cap = 64 * 2 ** 20            # conservative default (v7x-class)
    try:
        info = pltpu.get_tpu_info()
        cap = int(getattr(info, "vmem_capacity_bytes", cap))
    except Exception:
        pass
    return cap


def _select_batch_tile(batch, vmem_cap):
    """Generation-aware batch tile: amortize per-step overhead, cap by VMEM,
    and keep >=2 grid steps on 2-TensorCore (64-MiB-VMEM) parts when batch
    allows so the 'parallel' axis can be sharded across both cores."""
    small_vmem = vmem_cap < 96 * 2 ** 20        # v7x-class: 64 MiB VMEM, 2 TCs
    cap = 256 if small_vmem else 512            # review: ~256 on v7x, 512 on v5e/v6e
    min_steps = 2 if small_vmem else 1
    if batch <= 128:
        return _round_up(max(batch, 1), 8)      # tiny batch: one step, minimal padding
    tb = min(cap, _round_up(batch, 128))        # multiple of 128 (lane-dense out block)
    while tb > 128 and (batch + tb - 1) // tb < min_steps:
        tb //= 2
    return tb


def prob_attention(state_t, context, params, n_heads, *, block_b=None):
    """state_t: (B,1,D) f32, context: (B,N,D) f32 -> (B,N) f32 tanh scores."""
    B = state_t.shape[0]
    N, D = context.shape[1], context.shape[2]
    H = params["wm_t"].shape[1]
    hd = H // n_heads
    NH = N * H
    K = N * n_heads
    norm_mha = 1.0 / math.sqrt(H / n_heads)     # MHAlayer: 1/sqrt(head_dim)
    norm = 1.0 / math.sqrt(H)                   # ProbAttention: 1/sqrt(hidden_dim)

    f32, bf16 = jnp.float32, jnp.bfloat16
    eye_n = jnp.eye(N, dtype=f32)

    # ---- host-packed resident constants (hoisted out of the kernel body) ----
    # NOTE: the block-diagonal restructure assumes N*D stays small (here
    # N*D = 128 exactly -> a full-depth, lane-dense (TB,128)@(128,3*N*H)
    # context projection).
    w_q_rep = jnp.tile(params["wm_t"], (1, N)).astype(bf16)                # (D, NH)
    w_bd = jnp.concatenate(
        [jnp.kron(eye_n, params["wk1_t"]),
         jnp.kron(eye_n, params["wv1_t"]),
         jnp.kron(eye_n, params["wk2_t"])], axis=1).astype(bf16)           # (N*D, 3NH)

    head_of = jnp.arange(H) // hd
    base = (head_of[:, None] == jnp.arange(n_heads)[None, :]).astype(f32)  # (H, nh)
    seg_red = jnp.kron(eye_n, base) * norm_mha                             # (NH, K)
    expand = jnp.kron(eye_n, base.T)                                       # (K, NH)
    lane_head = jnp.arange(K) % n_heads
    gsum = (lane_head[:, None] == lane_head[None, :]).astype(f32)          # (K, K)
    collapse = jnp.tile(jnp.eye(H, dtype=f32), (N, 1))                     # (NH, H)
    wfc_rep = jnp.tile(params["wfc_t"].astype(f32), (1, N))                # (H, NH)
    group_t = jnp.kron(eye_n, jnp.ones((1, H), f32)) * norm                # (N, NH)

    # ---- lane-dense bf16 activation streams ----
    state2 = state_t.reshape(B, D).astype(bf16)
    ctx_flat = context.reshape(B, N * D).astype(bf16)

    # ---- generation-aware batch tile + explicit VMEM limit ----
    vmem_cap = _vmem_capacity_bytes()
    TB = _select_batch_tile(B, vmem_cap) if block_b is None else block_b
    B_pad = _round_up(B, TB)
    if B_pad != B:  # zero rows -> uniform softmax, tanh(0)=0; sliced off below
        state2 = jnp.pad(state2, ((0, B_pad - B), (0, 0)))
        ctx_flat = jnp.pad(ctx_flat, ((0, B_pad - B), (0, 0)))
    vmem_limit = max(32 * 2 ** 20, min(int(vmem_cap * 3 // 4), 100 * 2 ** 20))

    flops = int(2 * B_pad * (D * NH + N * D * 3 * NH + NH * K + K * K
                             + K * NH + NH * H + H * NH + NH * N))
    transcendentals = int(B_pad * (K + K + N))          # exp, 1/x, tanh
    bytes_accessed = int(B_pad * (N * D + D) * 2
                         + (D * NH + N * D * 3 * NH) * 2
                         + (NH * K + K * K + K * NH + NH * H + H * NH + N * NH) * 4
                         + N * B_pad * 4)

    out_t = pl.pallas_call(
        _prob_attention_kernel,
        out_shape=jax.ShapeDtypeStruct((N, B_pad), jnp.float32),
        grid_spec=pltpu.PrefetchScalarGridSpec(
            num_scalar_prefetch=0,
            grid=(B_pad // TB,),
            in_specs=[
                pl.BlockSpec((TB, D), lambda b: (b, 0)),          # state
                pl.BlockSpec((TB, N * D), lambda b: (b, 0)),      # context (flat)
                pl.BlockSpec((D, NH), lambda b: (0, 0)),          # W_query (tiled)
                pl.BlockSpec((N * D, 3 * NH), lambda b: (0, 0)),  # block-diag [K|V|Kp]
                pl.BlockSpec((NH, K), lambda b: (0, 0)),          # head reduce
                pl.BlockSpec((K, K), lambda b: (0, 0)),           # softmax group sum
                pl.BlockSpec((K, NH), lambda b: (0, 0)),          # score expand
                pl.BlockSpec((NH, H), lambda b: (0, 0)),          # V collapse
                pl.BlockSpec((H, NH), lambda b: (0, 0)),          # fc (tiled)
                pl.BlockSpec((N, NH), lambda b: (0, 0)),          # final node-sum^T
            ],
            out_specs=pl.BlockSpec((N, TB), lambda b: (0, b)),    # lane-dense (N, TB)
        ),
        compiler_params=pltpu.CompilerParams(
            dimension_semantics=("parallel",),
            vmem_limit_bytes=vmem_limit),
        cost_estimate=pl.CostEstimate(flops=flops,
                                      transcendentals=transcendentals,
                                      bytes_accessed=bytes_accessed),
    )(state2, ctx_flat, w_q_rep, w_bd, seg_red, gsum, expand, collapse,
      wfc_rep, group_t)
    # If profiling shows exposed context DMA on v5e, add
    # pipeline_mode=pl.Buffered(3) to the context BlockSpec above.
    return jnp.transpose(out_t)[:B]


def prob_attention_reference(state_t, context, params, n_heads):
    """Pure-JAX replica of the PyTorch forward (same bf16 input cast as the
    kernel's streamed operands; math in f32)."""
    B, N, D = context.shape
    H = params["wm_t"].shape[1]
    hd = H // n_heads
    st = state_t.astype(jnp.bfloat16).astype(jnp.float32)
    ctx = context.astype(jnp.bfloat16).astype(jnp.float32)
    wm = params["wm_t"].astype(jnp.bfloat16).astype(jnp.float32)
    wk1 = params["wk1_t"].astype(jnp.bfloat16).astype(jnp.float32)
    wv1 = params["wv1_t"].astype(jnp.bfloat16).astype(jnp.float32)
    wk2 = params["wk2_t"].astype(jnp.bfloat16).astype(jnp.float32)
    wfc = params["wfc_t"].astype(jnp.float32)

    Q = (st @ wm).reshape(B, 1, n_heads, hd).transpose(0, 2, 1, 3)
    K = (ctx @ wk1).reshape(B, N, n_heads, hd).transpose(0, 2, 1, 3)
    V = (ctx @ wv1).reshape(B, N, n_heads, hd).transpose(0, 2, 1, 3)
    norm_mha = 1.0 / math.sqrt(H / n_heads)
    comp = norm_mha * jnp.einsum("bhqd,bhkd->bhqk", Q, K)
    u = comp[:, :, 0, :]                                  # (B, n_heads, N)
    scores = jax.nn.softmax(u, axis=-1)
    out = jnp.einsum("bhk,bhkd->bhd", scores, V).reshape(B, H)
    out = out @ wfc
    Kp = ctx @ wk2
    comp2 = (1.0 / math.sqrt(H)) * jnp.einsum("bh,bnh->bn", out, Kp)
    return jnp.tanh(comp2)


def init_params(key, input_dim, hidden_dim):
    """Deterministic synthetic weights. nn.Linear weight is (out, in); we store
    the transpose (in, out) so the forward computes x @ W."""
    ks = jax.random.split(key, 5)
    scale_in = 1.0 / math.sqrt(input_dim)
    scale_h = 1.0 / math.sqrt(hidden_dim)
    return {
        "wm_t":  jax.random.normal(ks[0], (input_dim, hidden_dim), jnp.float32) * scale_in,
        "wk1_t": jax.random.normal(ks[1], (input_dim, hidden_dim), jnp.float32) * scale_in,
        "wv1_t": jax.random.normal(ks[2], (input_dim, hidden_dim), jnp.float32) * scale_in,
        "wfc_t": jax.random.normal(ks[3], (hidden_dim, hidden_dim), jnp.float32) * scale_h,
        "wk2_t": jax.random.normal(ks[4], (input_dim, hidden_dim), jnp.float32) * scale_in,
    }
    # Note: ProbAttention.self.w is defined in __init__ but unused in forward.


if __name__ == "__main__":
    batch, n_nodes, input_dim, hidden_dim, n_heads = 2, 8, 16, 32, 4

    key = jax.random.PRNGKey(0)
    k_state, k_ctx, k_params = jax.random.split(key, 3)
    state_t = jax.random.normal(k_state, (batch, 1, input_dim), jnp.float32)
    context = jax.random.normal(k_ctx, (batch, n_nodes, input_dim), jnp.float32)
    params = init_params(k_params, input_dim, hidden_dim)

    out = prob_attention(state_t, context, params, n_heads)
    out = jax.block_until_ready(out)

    ref = prob_attention_reference(state_t, context, params, n_heads)
    assert out.shape == (batch, n_nodes)
    # Tolerance accounts for bf16 matmul operands; structure/semantics of the
    # original forward (per-head softmax attention -> fc -> tanh scoring) are
    # what is validated.
    assert jnp.allclose(out, ref, atol=2e-2, rtol=2e-2), (out, ref)

    print("KERNEL_OK")
</pallas_src>

<mosaic_0001>
module attributes {stable_mosaic.version = 11 : i64} {
  func.func @_prob_attention_kernel(%arg0: i32, %arg1: memref<8x16xbf16, #tpu.memory_space<vmem>>, %arg2: memref<8x128xbf16, #tpu.memory_space<vmem>>, %arg3: memref<16x256xbf16, #tpu.memory_space<vmem>>, %arg4: memref<128x768xbf16, #tpu.memory_space<vmem>>, %arg5: memref<256x32xf32, #tpu.memory_space<vmem>>, %arg6: memref<32x32xf32, #tpu.memory_space<vmem>>, %arg7: memref<32x256xf32, #tpu.memory_space<vmem>>, %arg8: memref<256x32xf32, #tpu.memory_space<vmem>>, %arg9: memref<32x256xf32, #tpu.memory_space<vmem>>, %arg10: memref<8x256xf32, #tpu.memory_space<vmem>>, %arg11: memref<8x8xf32, #tpu.memory_space<vmem>>) attributes {dimension_semantics = [#tpu.dimension_semantics<parallel>], iteration_bounds = array<i64: 1>, scalar_prefetch = 0 : i64, scratch_operands = 0 : i64, tpu.core_type = #tpu.core_type<tc>, window_params = [{transform_indices = @transform_0, window_bounds = array<i64: 8, 16>}, {transform_indices = @transform_1, window_bounds = array<i64: 8, 128>}, {pipeline_mode = #tpu.pipeline_mode<synchronous>, transform_indices = @transform_2, window_bounds = array<i64: 16, 256>}, {pipeline_mode = #tpu.pipeline_mode<synchronous>, transform_indices = @transform_3, window_bounds = array<i64: 128, 768>}, {pipeline_mode = #tpu.pipeline_mode<synchronous>, transform_indices = @transform_4, window_bounds = array<i64: 256, 32>}, {pipeline_mode = #tpu.pipeline_mode<synchronous>, transform_indices = @transform_5, window_bounds = array<i64: 32, 32>}, {pipeline_mode = #tpu.pipeline_mode<synchronous>, transform_indices = @transform_6, window_bounds = array<i64: 32, 256>}, {pipeline_mode = #tpu.pipeline_mode<synchronous>, transform_indices = @transform_7, window_bounds = array<i64: 256, 32>}, {pipeline_mode = #tpu.pipeline_mode<synchronous>, transform_indices = @transform_8, window_bounds = array<i64: 32, 256>}, {pipeline_mode = #tpu.pipeline_mode<synchronous>, transform_indices = @transform_9, window_bounds = array<i64: 8, 256>}, {transform_indices = @transform_10, window_bounds = array<i64: 8, 8>}]} {
    %c0 = arith.constant 0 : index
    %c0_0 = arith.constant 0 : index
    %0 = vector.load %arg1[%c0, %c0_0] : memref<8x16xbf16, #tpu.memory_space<vmem>>, vector<8x16xbf16>
    %c0_1 = arith.constant 0 : index
    %c0_2 = arith.constant 0 : index
    %1 = vector.load %arg2[%c0_1, %c0_2] : memref<8x128xbf16, #tpu.memory_space<vmem>>, vector<8x128xbf16>
    %c0_3 = arith.constant 0 : index
    %c0_4 = arith.constant 0 : index
    %2 = vector.load %arg3[%c0_3, %c0_4] : memref<16x256xbf16, #tpu.memory_space<vmem>>, vector<16x256xbf16>
    %cst = arith.constant dense<0.000000e+00> : vector<8x256xf32>
    %3 = tpu.matmul %0, %2, %cst {dimension_numbers = #tpu.dot_dimension_numbers<[1], [0], [0], [1], [0, 0, 1, 1], [], []>} : vector<8x16xbf16>, vector<16x256xbf16>, vector<8x256xf32> -> vector<8x256xf32>
    %c0_5 = arith.constant 0 : index
    %c0_6 = arith.constant 0 : index
    %4 = vector.load %arg4[%c0_5, %c0_6] : memref<128x768xbf16, #tpu.memory_space<vmem>>, vector<128x768xbf16>
    %cst_7 = arith.constant dense<0.000000e+00> : vector<8x768xf32>
    %5 = tpu.matmul %1, %4, %cst_7 {dimension_numbers = #tpu.dot_dimension_numbers<[1], [0], [0], [1], [0, 0, 1, 1], [], []>} : vector<8x128xbf16>, vector<128x768xbf16>, vector<8x768xf32> -> vector<8x768xf32>
    %6 = vector.extract_strided_slice %5 {offsets = [0, 0], sizes = [8, 256], strides = [1, 1]} : vector<8x768xf32> to vector<8x256xf32>
    %7 = vector.extract_strided_slice %5 {offsets = [0, 256], sizes = [8, 256], strides = [1, 1]} : vector<8x768xf32> to vector<8x256xf32>
    %8 = vector.extract_strided_slice %5 {offsets = [0, 512], sizes = [8, 256], strides = [1, 1]} : vector<8x768xf32> to vector<8x256xf32>
    %9 = arith.mulf %3, %6 : vector<8x256xf32>
    %c0_8 = arith.constant 0 : index
    %c0_9 = arith.constant 0 : index
    %10 = vector.load %arg5[%c0_8, %c0_9] : memref<256x32xf32, #tpu.memory_space<vmem>>, vector<256x32xf32>
    %cst_10 = arith.constant dense<0.000000e+00> : vector<8x32xf32>
    %11 = tpu.matmul %9, %10, %cst_10 {dimension_numbers = #tpu.dot_dimension_numbers<[1], [0], [0], [1], [0, 0, 1, 1], [], []>} : vector<8x256xf32>, vector<256x32xf32>, vector<8x32xf32> -> vector<8x32xf32>
    %cst_11 = arith.constant dense<0xFF800000> : vector<8xf32>
    %12 = vector.multi_reduction <maximumf>, %11, %cst_11 [1] : vector<8x32xf32> to vector<8xf32>
    %13 = vector.shape_cast %12 : vector<8xf32> to vector<8x1xf32>
    %14 = vector.broadcast %13 : vector<8x1xf32> to vector<8x32xf32>
    %15 = arith.subf %11, %14 : vector<8x32xf32>
    %16 = math.exp %15 : vector<8x32xf32>
    %c0_12 = arith.constant 0 : index
    %c0_13 = arith.constant 0 : index
    %17 = vector.load %arg6[%c0_12, %c0_13] : memref<32x32xf32, #tpu.memory_space<vmem>>, vector<32x32xf32>
    %cst_14 = arith.constant dense<0.000000e+00> : vector<8x32xf32>
    %18 = tpu.matmul %16, %17, %cst_14 {dimension_numbers = #tpu.dot_dimension_numbers<[1], [0], [0], [1], [0, 0, 1, 1], [], []>} : vector<8x32xf32>, vector<32x32xf32>, vector<8x32xf32> -> vector<8x32xf32>
    %19 = tpu.reciprocal %18 : vector<8x32xf32> -> vector<8x32xf32>
    %20 = arith.mulf %16, %19 : vector<8x32xf32>
    %c0_15 = arith.constant 0 : index
    %c0_16 = arith.constant 0 : index
    %21 = vector.load %arg7[%c0_15, %c0_16] : memref<32x256xf32, #tpu.memory_space<vmem>>, vector<32x256xf32>
    %cst_17 = arith.constant dense<0.000000e+00> : vector<8x256xf32>
    %22 = tpu.matmul %20, %21, %cst_17 {dimension_numbers = #tpu.dot_dimension_numbers<[1], [0], [0], [1], [0, 0, 1, 1], [], []>} : vector<8x32xf32>, vector<32x256xf32>, vector<8x256xf32> -> vector<8x256xf32>
    %23 = arith.mulf %22, %7 : vector<8x256xf32>
    %c0_18 = arith.constant 0 : index
    %c0_19 = arith.constant 0 : index
    %24 = vector.load %arg8[%c0_18, %c0_19] : memref<256x32xf32, #tpu.memory_space<vmem>>, vector<256x32xf32>
    %cst_20 = arith.constant dense<0.000000e+00> : vector<8x32xf32>
    %25 = tpu.matmul %23, %24, %cst_20 {dimension_numbers = #tpu.dot_dimension_numbers<[1], [0], [0], [1], [0, 0, 1, 1], [], []>} : vector<8x256xf32>, vector<256x32xf32>, vector<8x32xf32> -> vector<8x32xf32>
    %c0_21 = arith.constant 0 : index
    %c0_22 = arith.constant 0 : index
    %26 = vector.load %arg9[%c0_21, %c0_22] : memref<32x256xf32, #tpu.memory_space<vmem>>, vector<32x256xf32>
    %cst_23 = arith.constant dense<0.000000e+00> : vector<8x256xf32>
    %27 = tpu.matmul %25, %26, %cst_23 {dimension_numbers = #tpu.dot_dimension_numbers<[1], [0], [0], [1], [0, 0, 1, 1], [], []>} : vector<8x32xf32>, vector<32x256xf32>, vector<8x256xf32> -> vector<8x256xf32>
    %c0_24 = arith.constant 0 : index
    %c0_25 = arith.constant 0 : index
    %28 = vector.load %arg10[%c0_24, %c0_25] : memref<8x256xf32, #tpu.memory_space<vmem>>, vector<8x256xf32>
    %29 = arith.mulf %27, %8 : vector<8x256xf32>
    %cst_26 = arith.constant dense<0.000000e+00> : vector<8x8xf32>
    %30 = tpu.matmul %28, %29, %cst_26 {dimension_numbers = #tpu.dot_dimension_numbers<[1], [1], [0], [0], [0, 0, 1, 0], [], []>} : vector<8x256xf32>, vector<8x256xf32>, vector<8x8xf32> -> vector<8x8xf32>
    %31 = math.tanh %30 : vector<8x8xf32>
    %c0_27 = arith.constant 0 : index
    %c0_28 = arith.constant 0 : index
    %32 = vector.load %arg11[%c0_27, %c0_28] : memref<8x8xf32, #tpu.memory_space<vmem>>, vector<8x8xf32>
    tpu.vector_store %arg11[%c0_27, %c0_28], %31 {strides = array<i32>} : memref<8x8xf32, #tpu.memory_space<vmem>>, vector<8x8xf32>,
    return
  }
  func.func @transform_0(%arg0: i32) -> (i32, i32) {
    %c0_i32 = arith.constant 0 : i32
    %c0_i32_0 = arith.constant 0 : i32
    return %arg0, %c0_i32 : i32, i32
  }
  func.func @transform_1(%arg0: i32) -> (i32, i32) {
    %c0_i32 = arith.constant 0 : i32
    %c0_i32_0 = arith.constant 0 : i32
    return %arg0, %c0_i32 : i32, i32
  }
  func.func @transform_2(%arg0: i32) -> (i32, i32) {
    %c0_i32 = arith.constant 0 : i32
    %c0_i32_0 = arith.constant 0 : i32
    %c0_i32_1 = arith.constant 0 : i32
    return %c0_i32, %c0_i32_0 : i32, i32
  }
  func.func @transform_3(%arg0: i32) -> (i32, i32) {
    %c0_i32 = arith.constant 0 : i32
    %c0_i32_0 = arith.constant 0 : i32
    %c0_i32_1 = arith.constant 0 : i32
    return %c0_i32, %c0_i32_0 : i32, i32
  }
  func.func @transform_4(%arg0: i32) -> (i32, i32) {
    %c0_i32 = arith.constant 0 : i32
    %c0_i32_0 = arith.constant 0 : i32
    %c0_i32_1 = arith.constant 0 : i32
    return %c0_i32, %c0_i32_0 : i32, i32
  }
  func.func @transform_5(%arg0: i32) -> (i32, i32) {
    %c0_i32 = arith.constant 0 : i32
    %c0_i32_0 = arith.constant 0 : i32
    %c0_i32_1 = arith.constant 0 : i32
    return %c0_i32, %c0_i32_0 : i32, i32
  }
  func.func @transform_6(%arg0: i32) -> (i32, i32) {
    %c0_i32 = arith.constant 0 : i32
    %c0_i32_0 = arith.constant 0 : i32
    %c0_i32_1 = arith.constant 0 : i32
    return %c0_i32, %c0_i32_0 : i32, i32
  }
  func.func @transform_7(%arg0: i32) -> (i32, i32) {
    %c0_i32 = arith.constant 0 : i32
    %c0_i32_0 = arith.constant 0 : i32
    %c0_i32_1 = arith.constant 0 : i32
    return %c0_i32, %c0_i32_0 : i32, i32
  }
  func.func @transform_8(%arg0: i32) -> (i32, i32) {
    %c0_i32 = arith.constant 0 : i32
    %c0_i32_0 = arith.constant 0 : i32
    %c0_i32_1 = arith.constant 0 : i32
    return %c0_i32, %c0_i32_0 : i32, i32
  }
  func.func @transform_9(%arg0: i32) -> (i32, i32) {
    %c0_i32 = arith.constant 0 : i32
    %c0_i32_0 = arith.constant 0 : i32
    %c0_i32_1 = arith.constant 0 : i32
    return %c0_i32, %c0_i32_0 : i32, i32
  }
  func.func @transform_10(%arg0: i32) -> (i32, i32) {
    %c0_i32 = arith.constant 0 : i32
    %c0_i32_0 = arith.constant 0 : i32
    return %c0_i32, %arg0 : i32, i32
  }
}

</mosaic_0001>

<bundles_post_ra>
// kernel: tpu_custom_call.1
= control target key start
LH: loop header
LB: loop body
LE: loop exit
PB: predicated region body
PF: predicated region fallthrough
CT: control target
= control target key end

     0   :  { %15 = vsyncpa [#allocation3], 0  ;;  %s1837_s0 = inlined_call_operand.hbm [shape: bf16[8,16], index: 0, kind: input, shape index: {}]   ;;  %s1838_s1 = inlined_call_operand.hbm [shape: bf16[8,128], index: 1, kind: input, shape index: {}]   ;;  %s1839_s2 = inlined_call_operand.vmem [shape: bf16[16,256], index: 2, kind: input, shape index: {}]   ;;  %s1840_s3 = inlined_call_operand.vmem [shape: bf16[128,768], index: 3, kind: input, shape index: {}]   ;;  %s1841_s4 = inlined_call_operand.vmem [shape: f32[256,32], index: 4, kind: input, shape index: {}]   ;;  %s1842_s5 = inlined_call_operand.vmem [shape: f32[32,32], index: 5, kind: input, shape index: {}]   ;;  %s1843_s6 = inlined_call_operand.vmem [shape: f32[32,256], index: 6, kind: input, shape index: {}]   ;;  %s1844_s7 = inlined_call_operand.vmem [shape: f32[256,32], index: 7, kind: input, shape index: {}]   ;;  %s1845_s8 = inlined_call_operand.vmem [shape: f32[32,256], index: 8, kind: input, shape index: {}]   ;;  %s1846_s9 = inlined_call_operand.vmem [shape: f32[8,256], index: 9, kind: input, shape index: {}]   ;;  %s1847_s10 = inlined_call_operand.hbm [shape: f32[8,8], index: 10, kind: output, shape index: {}]  }
   0x1   :  { %16 = vsyncpa [#allocation6], 0 }
   0x2   :  { %17 = vsyncpa [#allocation4], 0  ;;  %s23_s15 = sshll.u32 %s1837_s0, 4  ;;  %s1183_s16 = smov [#allocation2]   ;;  %s24_s15 = int_to_ptr.hbm [resolvable:$true] %s23_s15 }
   0x3   :  { %s25_s17 = sshll.u32 %s1183_s16, 4  ;;  %s34_s20 = sshll.u32 %s1838_s1, 4  ;;  %s26_s17 = int_to_ptr.vmem [resolvable:$true] %s25_s17  ;;  %s35_s20 = int_to_ptr.hbm [resolvable:$true] %s34_s20 }
   0x4   :  { %28 = dma.hbm_to_vmem [thread:$0]  %s24_s15, 64, %s26_s17, [#allocation3]  }
   0x5   :  { %s1184_s21 = smov [#allocation5]  }
   0x6   :  { %s36_s22 = sshll.u32 %s1184_s21, 4  ;;  %s37_s22 = int_to_ptr.vmem [resolvable:$true] %s36_s22 }
   0x7   :  { %39 = dma.hbm_to_vmem [thread:$0]  %s35_s20, 64, %s37_s22, [#allocation6]  }
   0x8   :  { %1177 = dma.done.wait [#allocation3], 64  }
   0x9   :  { %1178 = vsyncadd [#allocation3], 4294967232 }
   0xa   :  { %1179 = dma.done.wait [#allocation6], 64  }
   0xb   :  { %1180 = vsyncadd [#allocation6], 4294967232  ;;  %v1019_v0 = vld [vmem:[%s1840_s3 + $0x150] sm:$0xf]  ;;  %v1093_v1 = vld [vmem:[%s1840_s3 + $0x164] sm:$0xf0] }
   0xc   :  { %v1090_v2 = vld [vmem:[%s1840_s3 + $0x154] sm:$0xf]  ;;  %v1020_v3 = vor.u32 %v1093_v1, %v1019_v0  ;;  %v1021_v4 = vld [vmem:[%s1840_s3 + $0x168] sm:$0xf0]  ;;  %v995_v5 = vld [vmem:[%s1840_s3 + $0x120] sm:$0xf] }
   0xd   :  { %v1087_v6 = vld [vmem:[%s1840_s3 + $0x134] sm:$0xf0]  ;;  %v1024_v7 = vor.u32 %v1090_v2, %v1021_v4  ;;  %v1084_v8 = vld [vmem:[%s1840_s3 + $0x124] sm:$0xf]  ;;  %v997_v9 = vld [vmem:[%s1840_s3 + $0x138] sm:$0xf0] }
   0xe   :  { %397 = vmatpush.bf16.msra.mxu2 %v1020_v3  ;;  %v996_v10 = vor.u32 %v1087_v6, %v995_v5  ;;  %v1000_v11 = vor.u32 %v1084_v8, %v997_v9  ;;  %v971_v12 = vld [vmem:[%s1840_s3 + $0xf0] sm:$0xf]  ;;  %v1081_v13 = vld [vmem:[%s1840_s3 + $0x104] sm:$0xf0]  ;;  %v1078_v14 = vld [vmem:[%s1840_s3 + $0xf4] sm:$0xf] }
   0xf   :  { %410 = vmatpush.bf16.msra.mxu3 %v1024_v7  ;;  %v973_v15 = vld [vmem:[%s1840_s3 + $0x108] sm:$0xf0]  ;;  %v972_v16 = vor.u32 %v1081_v13, %v971_v12  ;;  %v947_v18 = vld [vmem:[%s1840_s3 + $0xc0] sm:$0xf]  ;;  %v1075_v19 = vld [vmem:[%s1840_s3 + $0xd4] sm:$0xf0] }
  0x10   :  { %v976_v17 = vor.u32 %v1078_v14, %v973_v15  ;;  %v1072_v20 = vld [vmem:[%s1840_s3 + $0xc4] sm:$0xf]  ;;  %v949_v21 = vld [vmem:[%s1840_s3 + $0xd8] sm:$0xf0]  ;;  %v841_v22 = vld [vmem:[%s1839_s2] sm:$0xf]  ;;  %v948_v27 = vor.u32 %v1075_v19, %v947_v18 }
  0x11   :  { %v1047_v23 = vld [vmem:[%s1839_s2 + $0x4] sm:$0xf0]  ;;  %v1046_v25 = vld [vmem:[%s1839_s2 + $0x4] sm:$0xf]  ;;  %v843_v26 = vld [vmem:[%s1839_s2 + $0x8] sm:$0xf0]  ;;  %v952_v32 = vor.u32 %v1072_v20, %v949_v21 }
  0x12   :  { %398 = vmatpush.bf16.msra.mxu2 %v996_v10  ;;  %v842_v24 = vor.u32 %v1047_v23, %v841_v22  ;;  %v923_v28 = vld [vmem:[%s1840_s3 + $0x90] sm:$0xf]  ;;  %v1069_v29 = vld [vmem:[%s1840_s3 + $0xa4] sm:$0xf0]  ;;  %v1066_v30 = vld [vmem:[%s1840_s3 + $0x94] sm:$0xf]  ;;  %v846_v31 = vor.u32 %v1046_v25, %v843_v26 }
  0x13   :  { %411 = vmatpush.bf16.msra.mxu3 %v1000_v11  ;;  %v925_v33 = vld [vmem:[%s1840_s3 + $0xa8] sm:$0xf0]  ;;  %v65_v34 = vld [vmem:[#allocation2] sm:$0xf]  ;;  %vm79_vm0 = vcmask 130048   ;;  %v924_v42 = vor.u32 %v1069_v29, %v923_v28  ;;  %vm549_vm1 = vcmask 261120  }
  0x14   :  { %90 = vmatpush.bf16.msra.mxu0 %v842_v24  ;;  %103 = vmatpush.bf16.msra.mxu1 %v846_v31  ;;  %v1027_v35 = vld [vmem:[%s1840_s3 + $0x158] sm:$0xf]  ;;  %v1094_v36 = vld [vmem:[%s1840_s3 + $0x16c] sm:$0xf0]  ;;  %v1091_v37 = vld [vmem:[%s1840_s3 + $0x15c] sm:$0xf]  ;;  %v928_v46 = vor.u32 %v1066_v30, %v925_v33 }
  0x15   :  { %v1028_v38 = vor.u32 %v1094_v36, %v1027_v35  ;;  %v1029_v39 = vld [vmem:[%s1840_s3 + $0x170] sm:$0xf0]  ;;  %v1003_v40 = vld [vmem:[%s1840_s3 + $0x128] sm:$0xf]  ;;  %v1088_v41 = vld [vmem:[%s1840_s3 + $0x13c] sm:$0xf0] }
  0x16   :  { %399 = vmatpush.bf16.msra.mxu2 %v972_v16  ;;  %v1032_v43 = vor.u32 %v1091_v37, %v1029_v39  ;;  %v1085_v44 = vld [vmem:[%s1840_s3 + $0x12c] sm:$0xf]  ;;  %v1005_v45 = vld [vmem:[%s1840_s3 + $0x140] sm:$0xf0]  ;;  %v899_v47 = vld [vmem:[%s1840_s3 + $0x60] sm:$0xf]  ;;  %v1004_v51 = vor.u32 %v1088_v41, %v1003_v40 }
  0x17   :  { %412 = vmatpush.bf16.msra.mxu3 %v976_v17  ;;  %847 = vmatmul.msk.bf16.vlgmr.msra.gmra.mxu0 %vm79_vm0, %v65_v34  ;;  %v1063_v48 = vld [vmem:[%s1840_s3 + $0x74] sm:$0xf0]  ;;  %v1060_v49 = vld [vmem:[%s1840_s3 + $0x64] sm:$0xf]  ;;  %v901_v50 = vld [vmem:[%s1840_s3 + $0x78] sm:$0xf0]  ;;  %v1008_v52 = vor.u32 %v1085_v44, %v1005_v45 }
  0x18   :  { %848 = vmatmul.msk.bf16.vlgmr.msra.gmra.mxu1 %vm79_vm0, %v65_v34  ;;  %423 = vmatpush.bf16.msrb.mxu0 %v1028_v38  ;;  %v979_v53 = vld [vmem:[%s1840_s3 + $0xf8] sm:$0xf]  ;;  %v1082_v54 = vld [vmem:[%s1840_s3 + $0x10c] sm:$0xf0]  ;;  %v1079_v55 = vld [vmem:[%s1840_s3 + $0xfc] sm:$0xf]  ;;  %v900_v57 = vor.u32 %v1063_v48, %v899_v47  ;;  %v904_v58 = vor.u32 %v1060_v49, %v901_v50 }
  0x19   :  { %436 = vmatpush.bf16.msrb.mxu1 %v1032_v43  ;;  %v981_v56 = vld [vmem:[%s1840_s3 + $0x110] sm:$0xf0]  ;;  %v875_v59 = vld [vmem:[%s1840_s3 + $0x30] sm:$0xf]  ;;  %v1057_v60 = vld [vmem:[%s1840_s3 + $0x44] sm:$0xf0]  ;;  %v980_v63 = vor.u32 %v1082_v54, %v979_v53 }
  0x1a   :  { %400 = vmatpush.bf16.msra.mxu2 %v948_v27  ;;  %v1054_v61 = vld [vmem:[%s1840_s3 + $0x34] sm:$0xf]  ;;  %v877_v62 = vld [vmem:[%s1840_s3 + $0x48] sm:$0xf0]  ;;  %v984_v0 = vor.u32 %v1079_v55, %v981_v56  ;;  %v955_v1 = vld [vmem:[%s1840_s3 + $0xc8] sm:$0xf]  ;;  %v876_v5 = vor.u32 %v1057_v60, %v875_v59 }
  0x1b   :  { %413 = vmatpush.bf16.msra.mxu3 %v952_v32  ;;  %v1076_v2 = vld [vmem:[%s1840_s3 + $0xdc] sm:$0xf0]  ;;  %v1073_v3 = vld [vmem:[%s1840_s3 + $0xcc] sm:$0xf]  ;;  %v957_v4 = vld [vmem:[%s1840_s3 + $0xe0] sm:$0xf0]  ;;  %v880_v6 = vor.u32 %v1054_v61, %v877_v62 }
  0x1c   :  { %424 = vmatpush.bf16.msrb.mxu0 %v1004_v51  ;;  %v851_v7 = vld [vmem:[%s1840_s3] sm:$0xf]  ;;  %v1051_v8 = vld [vmem:[%s1840_s3 + $0x14] sm:$0xf0]  ;;  %v1048_v9 = vld [vmem:[%s1840_s3 + $0x4] sm:$0xf]  ;;  %v956_v11 = vor.u32 %v1076_v2, %v955_v1  ;;  %v960_v12 = vor.u32 %v1073_v3, %v957_v4 }
  0x1d   :  { %437 = vmatpush.bf16.msrb.mxu1 %v1008_v52  ;;  %v853_v10 = vld [vmem:[%s1840_s3 + $0x18] sm:$0xf0]  ;;  %v931_v13 = vld [vmem:[%s1840_s3 + $0x98] sm:$0xf]  ;;  %v1070_v14 = vld [vmem:[%s1840_s3 + $0xac] sm:$0xf0]  ;;  %v852_v17 = vor.u32 %v1051_v8, %v851_v7 }
  0x1e   :  { %401 = vmatpush.bf16.msra.mxu2 %v924_v42  ;;  %v1067_v15 = vld [vmem:[%s1840_s3 + $0x9c] sm:$0xf]  ;;  %v933_v16 = vld [vmem:[%s1840_s3 + $0xb0] sm:$0xf0]  ;;  %v856_v18 = vor.u32 %v1048_v9, %v853_v10  ;;  %v932_v19 = vor.u32 %v1070_v14, %v931_v13  ;;  %v907_v21 = vld [vmem:[%s1840_s3 + $0x68] sm:$0xf] }
  0x1f   :  { %414 = vmatpush.bf16.msra.mxu3 %v928_v46  ;;  %v936_v20 = vor.u32 %v1067_v15, %v933_v16  ;;  %v1064_v22 = vld [vmem:[%s1840_s3 + $0x7c] sm:$0xf0]  ;;  %v1061_v23 = vld [vmem:[%s1840_s3 + $0x6c] sm:$0xf]  ;;  %v909_v24 = vld [vmem:[%s1840_s3 + $0x80] sm:$0xf0] }
  0x20   :  { %425 = vmatpush.bf16.msrb.mxu0 %v980_v63  ;;  %v1429_v25 = vld [vmem:[#allocation5] sm:$0xf]  ;;  %v908_v26 = vor.u32 %v1064_v22, %v907_v21  ;;  %v912_v27 = vor.u32 %v1061_v23, %v909_v24  ;;  %v883_v28 = vld [vmem:[%s1840_s3 + $0x38] sm:$0xf]  ;;  %v1058_v29 = vld [vmem:[%s1840_s3 + $0x4c] sm:$0xf0] }
  0x21   :  { %438 = vmatpush.bf16.msrb.mxu1 %v984_v0  ;;  %v1055_v30 = vld [vmem:[%s1840_s3 + $0x3c] sm:$0xf]  ;;  %v885_v31 = vld [vmem:[%s1840_s3 + $0x50] sm:$0xf0]  ;;  %v884_v32 = vor.u32 %v1058_v29, %v883_v28  ;;  %v859_v34 = vld [vmem:[%s1840_s3 + $0x8] sm:$0xf] }
  0x22   :  { %402 = vmatpush.bf16.msra.mxu2 %v900_v57  ;;  %v888_v33 = vor.u32 %v1055_v30, %v885_v31  ;;  %v1052_v35 = vld [vmem:[%s1840_s3 + $0x1c] sm:$0xf0]  ;;  %v1049_v36 = vld [vmem:[%s1840_s3 + $0xc] sm:$0xf]  ;;  %v861_v37 = vld [vmem:[%s1840_s3 + $0x20] sm:$0xf0] }
  0x23   :  { %415 = vmatpush.bf16.msra.mxu3 %v904_v58  ;;  %v860_v38 = vor.u32 %v1052_v35, %v859_v34  ;;  %v864_v39 = vor.u32 %v1049_v36, %v861_v37  ;;  %v492_v40 = vld [vmem:[%s1841_s4 + $0x78] sm:$0xff]  ;;  %v491_v42 = vld [vmem:[%s1841_s4 + $0x70] sm:$0xff]  ;;  %v490_v44 = vld [vmem:[%s1841_s4 + $0x68] sm:$0xff]  ;;  %s1185_s27 = smov [#allocation7]   ;;  %vm819_vm6 = vcmask 64512  }
  0x24   :  { %426 = vmatpush.bf16.msrb.mxu0 %v956_v11  ;;  %v508_v41 = vld [vmem:[%s1841_s4 + $0xf8] sm:$0xff]  ;;  %v507_v43 = vld [vmem:[%s1841_s4 + $0xf0] sm:$0xff]  ;;  %v506_v45 = vld [vmem:[%s1841_s4 + $0xe8] sm:$0xff] }
  0x25   :  { %439 = vmatpush.bf16.msrb.mxu1 %v960_v12  ;;  %v489_v46 = vld [vmem:[%s1841_s4 + $0x60] sm:$0xff]  ;;  %v488_v48 = vld [vmem:[%s1841_s4 + $0x58] sm:$0xff]  ;;  %v487_v50 = vld [vmem:[%s1841_s4 + $0x50] sm:$0xff] }
  0x26   :  { %403 = vmatpush.bf16.msra.mxu2 %v876_v5  ;;  %v505_v47 = vld [vmem:[%s1841_s4 + $0xe0] sm:$0xff]  ;;  %v504_v49 = vld [vmem:[%s1841_s4 + $0xd8] sm:$0xff]  ;;  %v503_v51 = vld [vmem:[%s1841_s4 + $0xd0] sm:$0xff] }
  0x27   :  { %416 = vmatpush.bf16.msra.mxu3 %v880_v6  ;;  %v486_v52 = vld [vmem:[%s1841_s4 + $0x48] sm:$0xff]  ;;  %v485_v54 = vld [vmem:[%s1841_s4 + $0x40] sm:$0xff]  ;;  %v484_v56 = vld [vmem:[%s1841_s4 + $0x38] sm:$0xff] }
  0x28   :  { %427 = vmatpush.bf16.msrb.mxu0 %v932_v19  ;;  %v502_v53 = vld [vmem:[%s1841_s4 + $0xc8] sm:$0xff]  ;;  %v501_v55 = vld [vmem:[%s1841_s4 + $0xc0] sm:$0xff]  ;;  %v500_v57 = vld [vmem:[%s1841_s4 + $0xb8] sm:$0xff] }
  0x29   :  { %440 = vmatpush.bf16.msrb.mxu1 %v936_v20  ;;  %v483_v58 = vld [vmem:[%s1841_s4 + $0x30] sm:$0xff]  ;;  %v482_v60 = vld [vmem:[%s1841_s4 + $0x28] sm:$0xff]  ;;  %v481_v62 = vld [vmem:[%s1841_s4 + $0x20] sm:$0xff] }
  0x2a   :  { %404 = vmatpush.bf16.msra.mxu2 %v852_v17  ;;  %v499_v59 = vld [vmem:[%s1841_s4 + $0xb0] sm:$0xff]  ;;  %v498_v61 = vld [vmem:[%s1841_s4 + $0xa8] sm:$0xff]  ;;  %v497_v63 = vld [vmem:[%s1841_s4 + $0xa0] sm:$0xff] }
  0x2b   :  { %417 = vmatpush.bf16.msra.mxu3 %v856_v18  ;;  %v480_v0 = vld [vmem:[%s1841_s4 + $0x18] sm:$0xff]  ;;  %v479_v2 = vld [vmem:[%s1841_s4 + $0x10] sm:$0xff]  ;;  %v478_v4 = vld [vmem:[%s1841_s4 + $0x8] sm:$0xff] }
  0x2c   :  { %428 = vmatpush.bf16.msrb.mxu0 %v908_v26  ;;  %v496_v1 = vld [vmem:[%s1841_s4 + $0x98] sm:$0xff]  ;;  %v495_v3 = vld [vmem:[%s1841_s4 + $0x90] sm:$0xff]  ;;  %v494_v5 = vld [vmem:[%s1841_s4 + $0x88] sm:$0xff] }
  0x2d   :  { %405 = vmatmul.bf16.vlgmr.msra.gmra.mxu2 %v1429_v25  ;;  %441 = vmatpush.bf16.msrb.mxu1 %v912_v27  ;;  %v477_v6 = vld [vmem:[%s1841_s4] sm:$0xff]  ;;  %v559_v27 = vld [vmem:[%s1842_s5 + $0x18] sm:$0xff]  ;;  %v558_v28 = vld [vmem:[%s1842_s5 + $0x10] sm:$0xff] }
  0x2e   :  { %418 = vmatmul.bf16.vlgmr.msra.gmra.mxu3 %v1429_v25  ;;  %v493_v7 = vld [vmem:[%s1841_s4 + $0x80] sm:$0xff]  ;;  %v557_v29 = vld [vmem:[%s1842_s5 + $0x8] sm:$0xff] }
  0x2f   :  { %v556_v30 = vld [vmem:[%s1842_s5] sm:$0xff]  ;;  %v1089_v35 = vld [vmem:[%s1840_s3 + $0x144] sm:$0xf0]  ;;  %s828_s5 = sshll.u32 %s1847_s10, 4  ;;  %s829_s5 = int_to_ptr.hbm [resolvable:$true] %s828_s5 }
  0x30   :  { %429 = vmatpush.bf16.msrb.mxu0 %v884_v32  ;;  %v1035_v31 = vld [vmem:[%s1840_s3 + $0x160] sm:$0xf]  ;;  %v1095_v32 = vld [vmem:[%s1840_s3 + $0x174] sm:$0xf0] }
  0x31   :  { %442 = vmatpush.bf16.msrb.mxu1 %v888_v33  ;;  %v1011_v33 = vld [vmem:[%s1840_s3 + $0x130] sm:$0xf]  ;;  %v1036_v34 = vor.u32 %v1095_v32, %v1035_v31  ;;  %v987_v37 = vld [vmem:[%s1840_s3 + $0x100] sm:$0xf]  ;;  %v676_v32 = vld [vmem:[%s1844_s7 + $0xc8] sm:$0xff] }
  0x32   :  { %v1012_v36 = vor.u32 %v1089_v35, %v1011_v33  ;;  %v893_v35 = vld [vmem:[%s1840_s3 + $0x58] sm:$0xf0] }
  0x33   :  { %449 = vmatpush.bf16.msrb.mxu2 %v1036_v34  ;;  %v1056_v34 = vld [vmem:[%s1840_s3 + $0x44] sm:$0xf] }
  0x34   :  { %430 = vmatpush.bf16.msrb.mxu0 %v860_v38  ;;  %v1083_v38 = vld [vmem:[%s1840_s3 + $0x114] sm:$0xf0] }
  0x35   :  { %443 = vmatpush.bf16.msrb.mxu1 %v864_v39  ;;  %v988_v39 = vor.u32 %v1083_v38, %v987_v37  ;;  %v675_v37 = vld [vmem:[%s1844_s7 + $0xc0] sm:$0xff] }
  0x37   :  { %431 = vmatmul.bf16.vlgmr.msrb.gmra.mxu0 %v1429_v25  ;;  %450 = vmatpush.bf16.msrb.mxu2 %v1012_v36 }
  0x38   :  { %509 = vmatpush.msra.mxu0 %v492_v40  ;;  %444 = vmatmul.bf16.vlgmr.msrb.gmra.mxu1 %v1429_v25  ;;  %v963_v40 = vld [vmem:[%s1840_s3 + $0xd0] sm:$0xf] }
  0x39   :  { %529 = vmatpush.msra.mxu1 %v508_v41  ;;  %v1077_v41 = vld [vmem:[%s1840_s3 + $0xe4] sm:$0xf0] }
  0x3a   :  { %510 = vmatpush.msra.mxu0 %v491_v42  ;;  %v964_v42 = vor.u32 %v1077_v41, %v963_v40  ;;  %v896_v40 = vor.u32 %v1056_v34, %v893_v35  ;;  %v674_v41 = vld [vmem:[%s1844_s7 + $0xb8] sm:$0xff]  ;;  %v775_v34 = vld [vmem:[%s1846_s9 + $0x8] sm:$0xff] }
  0x3b   :  { %530 = vmatpush.msra.mxu1 %v507_v43  ;;  %451 = vmatpush.bf16.msrb.mxu2 %v988_v39  ;;  %v939_v43 = vld [vmem:[%s1840_s3 + $0xa0] sm:$0xf] }
  0x3c   :  { %511 = vmatpush.msra.mxu0 %v490_v44  ;;  %v1071_v44 = vld [vmem:[%s1840_s3 + $0xb4] sm:$0xf0] }
  0x3d   :  { %531 = vmatpush.msra.mxu1 %v506_v45  ;;  %v940_v45 = vor.u32 %v1071_v44, %v939_v43  ;;  %v1050_v44 = vld [vmem:[%s1840_s3 + $0x14] sm:$0xf] }
  0x3e   :  { %512 = vmatpush.msra.mxu0 %v489_v46  ;;  %v915_v46 = vld [vmem:[%s1840_s3 + $0x70] sm:$0xf] }
  0x3f   :  { %532 = vmatpush.msra.mxu1 %v505_v47  ;;  %452 = vmatpush.bf16.msrb.mxu2 %v964_v42  ;;  %v1065_v47 = vld [vmem:[%s1840_s3 + $0x84] sm:$0xf0] }
  0x40   :  { %513 = vmatpush.msra.mxu0 %v488_v48  ;;  %v916_v48 = vor.u32 %v1065_v47, %v915_v46  ;;  %v673_v46 = vld [vmem:[%s1844_s7 + $0xb0] sm:$0xff] }
  0x41   :  { %533 = vmatpush.msra.mxu1 %v504_v49 }
  0x42   :  { %514 = vmatpush.msra.mxu0 %v487_v50  ;;  %v891_v50 = vld [vmem:[%s1840_s3 + $0x40] sm:$0xf] }
  0x43   :  { %534 = vmatpush.msra.mxu1 %v503_v51  ;;  %453 = vmatpush.bf16.msrb.mxu2 %v940_v45  ;;  %v1059_v51 = vld [vmem:[%s1840_s3 + $0x54] sm:$0xf0]  ;;  %v869_v45 = vld [vmem:[%s1840_s3 + $0x28] sm:$0xf0] }
  0x44   :  { %515 = vmatpush.msra.mxu0 %v486_v52 }
  0x45   :  { %535 = vmatpush.msra.mxu1 %v502_v53 }
  0x46   :  { %516 = vmatpush.msra.mxu0 %v485_v54  ;;  %v892_v54 = vor.u32 %v1059_v51, %v891_v50  ;;  %v672_v50 = vld [vmem:[%s1844_s7 + $0xa8] sm:$0xff] }
  0x47   :  { %536 = vmatpush.msra.mxu1 %v501_v55  ;;  %454 = vmatpush.bf16.msrb.mxu2 %v916_v48  ;;  %v867_v55 = vld [vmem:[%s1840_s3 + $0x10] sm:$0xf] }
  0x48   :  { %517 = vmatpush.msra.mxu0 %v484_v56  ;;  %v1053_v56 = vld [vmem:[%s1840_s3 + $0x24] sm:$0xf0] }
  0x49   :  { %537 = vmatpush.msra.mxu1 %v500_v57  ;;  %v868_v57 = vor.u32 %v1053_v56, %v867_v55  ;;  %v666_v55 = vld [vmem:[%s1844_s7 + $0x78] sm:$0xff]  ;;  %v665_v56 = vld [vmem:[%s1844_s7 + $0x70] sm:$0xff] }
  0x4a   :  { %518 = vmatpush.msra.mxu0 %v483_v58 }
  0x4b   :  { %538 = vmatpush.msra.mxu1 %v499_v59  ;;  %455 = vmatpush.bf16.msrb.mxu2 %v892_v54  ;;  %v605_v59 = vld [vmem:[%s1843_s6 + $0x38] sm:$0xff] }
  0x4c   :  { %519 = vmatpush.msra.mxu0 %v482_v60  ;;  %v604_v60 = vld [vmem:[%s1843_s6 + $0x30] sm:$0xff] }
  0x4d   :  { %539 = vmatpush.msra.mxu1 %v498_v61  ;;  %v603_v61 = vld [vmem:[%s1843_s6 + $0x28] sm:$0xff] }
  0x4e   :  { %520 = vmatpush.msra.mxu0 %v481_v62  ;;  %v602_v62 = vld [vmem:[%s1843_s6 + $0x20] sm:$0xff] }
  0x4f   :  { %540 = vmatpush.msra.mxu1 %v497_v63  ;;  %456 = vmatpush.bf16.msrb.mxu2 %v868_v57  ;;  %v600_v63 = vld [vmem:[%s1843_s6 + $0x10] sm:$0xff]  ;;  %v664_v57 = vld [vmem:[%s1844_s7 + $0x68] sm:$0xff] }
  0x50   :  { %521 = vmatpush.msra.mxu0 %v480_v0  ;;  %v601_v0 = vld [vmem:[%s1843_s6 + $0x18] sm:$0xff] }
  0x51   :  { %541 = vmatpush.msra.mxu1 %v496_v1  ;;  %v598_v1 = vld [vmem:[%s1843_s6] sm:$0xff] }
  0x52   :  { %522 = vmatpush.msra.mxu0 %v479_v2  ;;  %457 = vmatmul.bf16.vlgmr.msrb.gmra.mxu2 %v1429_v25  ;;  %v599_v2 = vld [vmem:[%s1843_s6 + $0x8] sm:$0xff]  ;;  %s826_s6 = sshll.u32 %s1185_s27, 4  ;;  %s827_s6 = int_to_ptr.vmem [resolvable:$true] %s826_s6 }
  0x53   :  { %542 = vmatpush.msra.mxu1 %v495_v3  ;;  %641 = vmatpush.msra.mxu2 %v605_v59  ;;  %v1092_v3 = vld [vmem:[%s1840_s3 + $0x164] sm:$0xf]  ;;  %v662_v59 = vld [vmem:[%s1844_s7 + $0x58] sm:$0xff] }
  0x54   :  { %523 = vmatpush.msra.mxu0 %v478_v4  ;;  %v1037_v4 = vld [vmem:[%s1840_s3 + $0x178] sm:$0xf0] }
  0x55   :  { %543 = vmatpush.msra.mxu1 %v494_v5  ;;  %642 = vmatpush.msra.mxu2 %v603_v61  ;;  %v1086_v5 = vld [vmem:[%s1840_s3 + $0x134] sm:$0xf]  ;;  %v659_v61 = vld [vmem:[%s1844_s7 + $0x40] sm:$0xff] }
  0x56   :  { %524 = vmatpush.msra.mxu0 %v477_v6  ;;  %v1040_v6 = vor.u32 %v1092_v3, %v1037_v4  ;;  %v653_v3 = vld [vmem:[%s1844_s7 + $0x10] sm:$0xff]  ;;  %v652_v4 = vld [vmem:[%s1844_s7 + $0x8] sm:$0xff] }
  0x57   :  { %544 = vmatpush.msra.mxu1 %v493_v7  ;;  %643 = vmatpush.msra.mxu2 %v601_v0  ;;  %v1013_v7 = vld [vmem:[%s1840_s3 + $0x148] sm:$0xf0] }
  0x58   :  { %462 = vmatpush.bf16.msrb.mxu3 %v1040_v6  ;;  %v656_v0 = vld [vmem:[%s1844_s7 + $0x28] sm:$0xff]  ;;  %v651_v6 = vld [vmem:[%s1844_s7] sm:$0xff] }
  0x59   :  { %575 = vmatpush.msrb.mxu1 %v559_v27  ;;  %644 = vmatpush.msra.mxu2 %v599_v2  ;;  %v1062_v27 = vld [vmem:[%s1840_s3 + $0x74] sm:$0xf]  ;;  %v654_v2 = vld [vmem:[%s1844_s7 + $0x18] sm:$0xff] }
  0x5b   :  { %576 = vmatpush.msrb.mxu1 %v558_v28  ;;  %v917_v28 = vld [vmem:[%s1840_s3 + $0x88] sm:$0xf0] }
  0x5c   :  { %v920_v31 = vor.u32 %v1062_v27, %v917_v28 }
  0x5d   :  { %577 = vmatpush.msrb.mxu1 %v557_v29  ;;  %v677_v29 = vld [vmem:[%s1844_s7 + $0xd0] sm:$0xff] }
  0x5f   :  { %578 = vmatpush.msrb.mxu1 %v556_v30 }
  0x94   :  { %v92_v8 = vpop.f32.mrf.mxu0 }
  0x95   :  { %v105_v9 = vpop.f32.mrf.mxu1 }
  0x9c   :  { %v94_v10 = vpop.f32.mrf.mxu0 }
  0x9d   :  { %v107_v11 = vpop.f32.mrf.mxu1  ;;  %v989_v10 = vld [vmem:[%s1840_s3 + $0x118] sm:$0xf0] }
  0xb0   :  { %v406_v12 = vpop.f32.mrf.mxu2 }
  0xb1   :  { %v475_v13 = vmul.f32 %v406_v12, %v92_v8  ;;  %v419_v14 = vpop.f32.mrf.mxu3  ;;  %v1016_v8 = vor.u32 %v1086_v5, %v1013_v7  ;;  %v682_v12 = vld [vmem:[%s1844_s7 + $0xf8] sm:$0xff]  ;;  %v671_v5 = vld [vmem:[%s1844_s7 + $0xa0] sm:$0xff] }
  0xb2   :  { %v476_v15 = vmul.f32 %v419_v14, %v105_v9  ;;  %v1080_v9 = vld [vmem:[%s1840_s3 + $0x104] sm:$0xf]  ;;  %v965_v14 = vld [vmem:[%s1840_s3 + $0xe8] sm:$0xf0]  ;;  %703 = vmatpush.msrb.mxu0 %v682_v12  ;;  %v670_v7 = vld [vmem:[%s1844_s7 + $0x98] sm:$0xff] }
  0xb3   :  { %525 = vmatmul.f32.vlgmr.msra.gmra.mxu0 %v475_v13  ;;  %463 = vmatpush.bf16.msrb.mxu3 %v1016_v8  ;;  %v992_v11 = vor.u32 %v1080_v9, %v989_v10  ;;  %v1074_v13 = vld [vmem:[%s1840_s3 + $0xd4] sm:$0xf]  ;;  %v668_v9 = vld [vmem:[%s1844_s7 + $0x88] sm:$0xff]  ;;  %v667_v10 = vld [vmem:[%s1844_s7 + $0x80] sm:$0xff] }
  0xb4   :  { %545 = vmatmul.f32.vlgmr.msra.gmra.mxu1 %v476_v15  ;;  %v1555_v18 = vpop.f32.mrf.mxu0  ;;  %v681_v15 = vld [vmem:[%s1844_s7 + $0xf0] sm:$0xff]  ;;  %v730_v12 = vld [vmem:[%s1845_s8 + $0x38] sm:$0xff] }
  0xb5   :  { %v1557_v19 = vpop.f32.mrf.mxu1  ;;  %621 = vmatpush.msra.mxu1 %v604_v60  ;;  %704 = vmatpush.msrb.mxu0 %v681_v15  ;;  %v661_v60 = vld [vmem:[%s1844_s7 + $0x50] sm:$0xff] }
  0xb6   :  { %v669_v8 = vld [vmem:[%s1844_s7 + $0x90] sm:$0xff]  ;;  %766 = vmatpush.msrb.mxu2 %v730_v12 }
  0xb7   :  { %622 = vmatpush.msra.mxu1 %v602_v62  ;;  %464 = vmatpush.bf16.msrb.mxu3 %v992_v11  ;;  %v658_v62 = vld [vmem:[%s1844_s7 + $0x38] sm:$0xff]  ;;  %v729_v11 = vld [vmem:[%s1845_s8 + $0x30] sm:$0xff] }
  0xb8   :  { %v408_v16 = vpop.f32.mrf.mxu2 }
  0xb9   :  { %v421_v17 = vpop.f32.mrf.mxu3  ;;  %623 = vmatpush.msra.mxu1 %v600_v63  ;;  %v968_v16 = vor.u32 %v1074_v13, %v965_v14  ;;  %v657_v63 = vld [vmem:[%s1844_s7 + $0x30] sm:$0xff]  ;;  %v727_v13 = vld [vmem:[%s1845_s8 + $0x20] sm:$0xff]  ;;  %v728_v14 = vld [vmem:[%s1845_s8 + $0x28] sm:$0xff] }
  0xba   :  { %v680_v17 = vld [vmem:[%s1844_s7 + $0xe8] sm:$0xff]  ;;  %767 = vmatpush.msrb.mxu2 %v728_v14 }
  0xbb   :  { %624 = vmatpush.msra.mxu1 %v598_v1  ;;  %705 = vmatpush.msrb.mxu0 %v680_v17  ;;  %v655_v1 = vld [vmem:[%s1844_s7 + $0x20] sm:$0xff] }
  0xbc   :  { %v434_v20 = vpop.f32.mrf.mxu0  ;;  %465 = vmatpush.bf16.msrb.mxu3 %v968_v16 }
  0xbd   :  { %v447_v21 = vpop.f32.mrf.mxu1 }
  0xbe   :  { %v1068_v21 = vld [vmem:[%s1840_s3 + $0xa4] sm:$0xf] }
  0xd5   :  { %v1712_v36 = vpop.f32.mrf.mxu2 }
 0x130   :  { %v526_v22 = vpop.f32.mrf.mxu0 }
 0x131   :  { %v546_v23 = vpop.f32.mrf.mxu1 }
 0x132   :  { %v547_v24 = vadd.f32 %v546_v23, %v526_v22  ;;  %v941_v22 = vld [vmem:[%s1840_s3 + $0xb8] sm:$0xf0]  ;;  %v679_v23 = vld [vmem:[%s1844_s7 + $0xe0] sm:$0xff] }
 0x133   :  { %706 = vmatpush.msrb.mxu0 %v679_v23  ;;  %v725_v23 = vld [vmem:[%s1845_s8 + $0x10] sm:$0xff] }
 0x134   :  { %v550_v26 = vsel %vm549_vm1, %v547_v24, -inf }
 0x135   :  { %551 = vmax.xlane.f32.xlu0 %v550_v26  ;;  %v678_v26 = vld [vmem:[%s1844_s7 + $0xd8] sm:$0xff] }
 0x136   :  { %707 = vmatpush.msrb.mxu0 %v678_v26 }
 0x138   :  { %708 = vmatpush.msrb.mxu0 %v677_v29 }
 0x13a   :  { %709 = vmatpush.msrb.mxu0 %v676_v32 }
 0x13c   :  { %710 = vmatpush.msrb.mxu0 %v675_v37 }
 0x13e   :  { %711 = vmatpush.msrb.mxu0 %v674_v41 }
 0x140   :  { %712 = vmatpush.msrb.mxu0 %v673_v46 }
 0x142   :  { %713 = vmatpush.msrb.mxu0 %v672_v50 }
 0x144   :  { %714 = vmatpush.msrb.mxu0 %v671_v5 }
 0x146   :  { %715 = vmatpush.msrb.mxu0 %v670_v7 }
 0x148   :  { %716 = vmatpush.msrb.mxu0 %v669_v8 }
 0x14a   :  { %717 = vmatpush.msrb.mxu0 %v668_v9 }
 0x14c   :  { %718 = vmatpush.msrb.mxu0 %v667_v10 }
 0x1a8   :  { %v552_v49 = vpop.xlane.xlu0 %551 }
 0x1a9   :  { %v553_v52 = vsub.f32 %v547_v24, %v552_v49  ;;  %v944_v24 = vor.u32 %v1068_v21, %v941_v22  ;;  %v872_v49 = vor.u32 %v1050_v44, %v869_v45 }
 0x1ab   :  { %v554_v53 = vmul.f32 1.442695, %v553_v52  ;;  %466 = vmatpush.bf16.msrb.mxu3 %v944_v24  ;;  %v460_v52 = vpop.f32.mrf.mxu2  ;;  %v726_v24 = vld [vmem:[%s1845_s8 + $0x18] sm:$0xff] }
 0x1ac   :  { %768 = vmatpush.msrb.mxu2 %v726_v24 }
 0x1ad   :  { %1099 = vpow2.f32 %v554_v53 }
 0x1af   :  { %467 = vmatpush.bf16.msrb.mxu3 %v920_v31  ;;  %v774_v31 = vld [vmem:[%s1846_s9] sm:$0xff] }
 0x1b3   :  { %v1620_v58 = vpop.eup %1099  ;;  %468 = vmatpush.bf16.msrb.mxu3 %v896_v40 }
 0x1b4   :  { %1041 = vmatmul.msk.f32.vlgmr.msrb.gmra.mxu1 %vm549_vm1, %v1620_v58 }
 0x1b5   :  { %746 = vmatpush.msrb.mxu1 %v729_v11 }
 0x1b7   :  { %469 = vmatpush.bf16.msrb.mxu3 %v872_v49  ;;  %747 = vmatpush.msrb.mxu1 %v727_v13 }
 0x1b9   :  { %748 = vmatpush.msrb.mxu1 %v725_v23 }
 0x1ba   :  { %470 = vmatmul.bf16.vlgmr.msrb.gmra.mxu3 %v1429_v25  ;;  %v660_v25 = vld [vmem:[%s1844_s7 + $0x48] sm:$0xff] }
 0x1bb   :  { %683 = vmatpush.msra.mxu3 %v666_v55 }
 0x1bd   :  { %684 = vmatpush.msra.mxu3 %v665_v56 }
 0x1bf   :  { %685 = vmatpush.msra.mxu3 %v664_v57 }
 0x231   :  { %v580_v20 = vpop.f32.mrf.mxu1 }
 0x232   :  { %1101 = vrcp.f32 %v580_v20  ;;  %v594_v39 = vand.u32 2147483648, %v580_v20  ;;  %v592_v43 = vand.u32 2147483647, %v580_v20  ;;  %vm588_vm3 = vweird.f32 %v580_v20 }
 0x234   :  { %v595_v48 = vor.u32 1.1754944e-38, %v594_v39  ;;  %vm593_vm5 = vcmp.eq.f32.partialorder %v592_v43, 8.507059e+37 }
 0x238   :  { %v1102_v30 = vpop.eup %1101 }
 0x239   :  { %v584_v33 = vmul.f32 %v1102_v30, %v580_v20  ;;  %vm589_vm2 = vweird.f32 %v1102_v30 }
 0x23a   :  { %vm590_vm4 = vmor %vm588_vm3, %vm589_vm2 }
 0x23b   :  { %v585_v38 = vsub.f32 1.0, %v584_v33 }
 0x23d   :  { %v586_v42 = vmul.f32 %v1102_v30, %v585_v38  ;;  %v471_v21 = vpop.f32.mrf.mxu3 }
 0x23f   :  { %v587_v47 = vadd.f32 %v1102_v30, %v586_v42 }
 0x241   :  { %v591_v51 = vsel %vm590_vm4, %v1102_v30, %v587_v47 }
 0x242   :  { %v596_v53 = vsel %vm593_vm5, %v595_v48, %v591_v51 }
 0x243   :  { %v597_v54 = vmul.f32 %v1620_v58, %v596_v53  ;;  %v663_v58 = vld [vmem:[%s1844_s7 + $0x60] sm:$0xff] }
 0x244   :  { %686 = vmatpush.msra.mxu3 %v663_v58 }
 0x245   :  { %1042 = vmatmul.msk.f32.vlgmr.msra.gmra.mxu1 %vm549_vm1, %v597_v54  ;;  %1043 = vmatmul.msk.f32.vlgmr.msra.gmra.mxu2 %vm549_vm1, %v597_v54  ;;  %v473_v22 = vpop.f32.mrf.mxu3 }
 0x246   :  { %687 = vmatpush.msra.mxu3 %v662_v59 }
 0x248   :  { %688 = vmatpush.msra.mxu3 %v661_v60 }
 0x24a   :  { %689 = vmatpush.msra.mxu3 %v660_v25 }
 0x24c   :  { %690 = vmatpush.msra.mxu3 %v659_v61 }
 0x24e   :  { %691 = vmatpush.msra.mxu3 %v658_v62 }
 0x250   :  { %692 = vmatpush.msra.mxu3 %v657_v63 }
 0x252   :  { %693 = vmatpush.msra.mxu3 %v656_v0 }
 0x254   :  { %694 = vmatpush.msra.mxu3 %v655_v1 }
 0x256   :  { %695 = vmatpush.msra.mxu3 %v654_v2 }
 0x258   :  { %696 = vmatpush.msra.mxu3 %v653_v3 }
 0x25a   :  { %697 = vmatpush.msra.mxu3 %v652_v4 }
 0x25c   :  { %698 = vmatpush.msra.mxu3 %v651_v6 }
 0x2c2   :  { %v626_v15 = vpop.f32.mrf.mxu1 }
 0x2c3   :  { %v649_v16 = vmul.f32 %v626_v15, %v1555_v18  ;;  %v723_v18 = vld [vmem:[%s1845_s8] sm:$0xff] }
 0x2c4   :  { %749 = vmatpush.msrb.mxu1 %v723_v18 }
 0x2c5   :  { %699 = vmatmul.f32.vlgmr.msra.gmra.mxu3 %v649_v16 }
 0x2c8   :  { %v646_v17 = vpop.f32.mrf.mxu2 }
 0x2c9   :  { %v650_v20 = vmul.f32 %v646_v17, %v1557_v19  ;;  %v724_v19 = vld [vmem:[%s1845_s8 + $0x8] sm:$0xff] }
 0x2ca   :  { %769 = vmatpush.msrb.mxu2 %v724_v19 }
 0x2cb   :  { %719 = vmatmul.f32.vlgmr.msrb.gmra.mxu0 %v650_v20 }
 0x348   :  { %v700_v26 = vpop.f32.mrf.mxu3  ;;  %v720_v27 = vpop.f32.mrf.mxu0 }
 0x349   :  { %v721_v28 = vadd.f32 %v720_v27, %v700_v26 }
 0x34b   :  { %1044 = vmatmul.msk.f32.vlgmr.msrb.gmra.mxu1 %vm549_vm1, %v721_v28  ;;  %1045 = vmatmul.msk.f32.vlgmr.msrb.gmra.mxu2 %vm549_vm1, %v721_v28 }
 0x3c8   :  { %v751_v29 = vpop.f32.mrf.mxu1 }
 0x3c9   :  { %v776_v30 = vmul.f32 %v751_v29, %v1712_v36 }
 0x3cb   :  { %793 = vmatpush.xpose.msra.mxu1 %v776_v30 }
 0x3ce   :  { %v771_v32 = vpop.f32.mrf.mxu2  ;;  %794 = vmatmul.f32.vlgmr.msra.gmra.mxu1 %v774_v31 }
 0x3cf   :  { %v777_v33 = vmul.f32 %v771_v32, %v471_v21 }
 0x3d1   :  { %813 = vmatpush.xpose.msra.mxu2 %v777_v33 }
 0x3d4   :  { %814 = vmatmul.f32.vlgmr.msra.gmra.mxu2 %v775_v34 }
 0x44b   :  { %v795_v35 = vpop.f32.mrf.mxu1 }
 0x457   :  { %v815_v37 = vpop.f32.mrf.mxu2 }
 0x458   :  { %v816_v38 = vadd.f32 %v815_v37, %v795_v35 }
 0x45a   :  { %1103 = vtanh.f32 %v816_v38 }
 0x460   :  { %v1104_v36 = vpop.eup %1103 }
 0x461   :  { %820 = vst.msk [vmem:[#allocation7] sm:$0xff] %vm819_vm6, %v1104_v36 }
 0x462   :  { %831 = dma.vmem_to_hbm [thread:$0]  %s827_s6, 128, %s829_s5, [#allocation4]  }
 0x463   :  { %1181 = dma.done.wait [#allocation4], 128  }
 0x464   :  { %1182 = vsyncadd [#allocation4], 4294967168 }
 0x465   :  { %836 = vsyncpa [#allocation3], 1 }
 0x466   :  { %837 = vsyncpa [#allocation6], 1 }
 0x467   :  { %838 = vsyncpa [#allocation4], 1 }

</bundles_post_ra>
